<compile_context>
chip_gen: v7x
topology: tpu7x:2x2x1
jax: 0.10.0
libtpu: 0.0.40
codegen_flags: <defaults>
</compile_context>

<pallas_src>
import functools

import jax
import jax.numpy as jnp
from jax.experimental import pallas as pl
from jax.experimental.pallas import tpu as pltpu


def _round_up(x, m):
    return (x + m - 1) // m * m


# ----------------------------------------------------------------------------
# Pallas kernels
# ----------------------------------------------------------------------------
def _make_matmul_kernel(activation):
    """One (tm, K) x (K, tn) MXU matmul with fused bias + optional activation."""

    def kernel(a_ref, b_ref, bias_ref, o_ref):
        r = jnp.dot(a_ref[...], b_ref[...], preferred_element_type=jnp.float32)
        r = r + bias_ref[...]
        if activation == "relu":
            r = jnp.maximum(r, 0.0)
        elif activation == "tanh":
            r = jnp.tanh(r)
        o_ref[...] = r.astype(o_ref.dtype)

    return kernel


def _bn_relu_kernel(x_ref, gamma_ref, beta_ref, o_ref):
    """BatchNorm (training-mode batch stats, eps=1e-5) + ReLU over (rows, C)."""
    x = x_ref[...]
    mean = jnp.mean(x, axis=0, keepdims=True)
    var = jnp.mean((x - mean) ** 2, axis=0, keepdims=True)
    xhat = (x - mean) * jax.lax.rsqrt(var + 1e-5)
    o_ref[...] = jnp.maximum(xhat * gamma_ref[...] + beta_ref[...], 0.0)


# ----------------------------------------------------------------------------
# Pallas wrappers
# ----------------------------------------------------------------------------
def pallas_matmul(a, b, bias, activation=None):
    """act(a @ b + bias); a:(M,K), b:(K,N), bias:(N,).  bf16 inputs, f32 output."""
    M, K = a.shape
    _, N = b.shape
    a = a.astype(jnp.bfloat16)
    b = b.astype(jnp.bfloat16)
    bias = bias.astype(jnp.float32)

    # Tile selection: keep the whole (padded) M and K in a single block when
    # small so there is no reduction grid axis and few grid steps; pad an
    # operand only when it is actually misaligned.
    tm = _round_up(M, 16)
    if tm > 1024:
        tm = 256
    tn = min(256, _round_up(N, 128))
    Mp, Np, Kp = _round_up(M, tm), _round_up(N, tn), _round_up(K, 128)

    if Mp != M or Kp != K:
        a = jnp.pad(a, ((0, Mp - M), (0, Kp - K)))
    if Kp != K or Np != N:
        b = jnp.pad(b, ((0, Kp - K), (0, Np - N)))
    if Np != N:
        bias = jnp.pad(bias, (0, Np - N))
    bias = bias.reshape(1, Np)

    out = pl.pallas_call(
        _make_matmul_kernel(activation),
        out_shape=jax.ShapeDtypeStruct((Mp, Np), jnp.float32),
        grid_spec=pltpu.PrefetchScalarGridSpec(
            num_scalar_prefetch=0,
            grid=(Mp // tm, Np // tn),
            in_specs=[
                pl.BlockSpec((tm, Kp), lambda i, j: (i, 0)),
                pl.BlockSpec((Kp, tn), lambda i, j: (0, j)),
                pl.BlockSpec((1, tn), lambda i, j: (0, j)),
            ],
            out_specs=pl.BlockSpec((tm, tn), lambda i, j: (i, j)),
        ),
        compiler_params=pltpu.CompilerParams(
            dimension_semantics=("parallel", "parallel"),
        ),
    )(a, b, bias)

    if Mp != M or Np != N:
        out = out[:M, :N]
    return out


def pallas_bn_relu(x, gamma, beta):
    """x: (R, C) channel-last float32; batch statistics taken over R."""
    R, C = x.shape
    return pl.pallas_call(
        _bn_relu_kernel,
        out_shape=jax.ShapeDtypeStruct((R, C), jnp.float32),
        grid=(1,),
        in_specs=[
            pl.BlockSpec((R, C), lambda i: (0, 0)),
            pl.BlockSpec((1, C), lambda i: (0, 0)),
            pl.BlockSpec((1, C), lambda i: (0, 0)),
        ],
        out_specs=pl.BlockSpec((R, C), lambda i: (0, 0)),
    )(x, gamma.reshape(1, C), beta.reshape(1, C))


# ----------------------------------------------------------------------------
# ConvTranspose2d(k=4, s=2, pad=1) via 2x2 output-parity decomposition.
# One bf16 Pallas matmul of (B*(H+1)*(W+1), 4*Cin) x (4*Cin, 4*Cout); the
# 2x2 interleave + boundary crop is cheap JAX glue on the output-sized result.
# ----------------------------------------------------------------------------
def conv_transpose2d_s2p1(x_nhwc, wt, bias, activation=None):
    # x_nhwc: (B, H, W, Cin);  wt: (Cin, Cout, 4, 4) PyTorch ConvTranspose2d layout
    B, H, W, Cin = x_nhwc.shape
    Cout = wt.shape[1]

    xp = jnp.pad(x_nhwc.astype(jnp.bfloat16), ((0, 0), (1, 1), (1, 1), (0, 0)))
    taps = [xp[:, dh:dh + H + 1, dw:dw + W + 1, :] for dh in (0, 1) for dw in (0, 1)]
    patches = jnp.stack(taps, axis=3)                          # (B, H+1, W+1, 4, Cin)
    patches = patches.reshape(B * (H + 1) * (W + 1), 4 * Cin)  # rows (b,m,n), cols (dh,dw,ci)

    w = jnp.transpose(wt.astype(jnp.bfloat16), (2, 3, 0, 1))   # (4,4,Cin,Cout) [kh,kw,ci,co]
    w = w.reshape(2, 2, 2, 2, Cin, Cout)                       # [ah, th, aw, tw, ci, co]
    w = w[::-1, :, ::-1, :, :, :]                              # [dh, th, dw, tw, ci, co]
    wmat = jnp.transpose(w, (0, 2, 4, 1, 3, 5)).reshape(4 * Cin, 4 * Cout)

    y = pallas_matmul(patches, wmat, jnp.tile(bias, 4), activation=activation)

    r = y.reshape(B, H + 1, W + 1, 2, 2, Cout)                 # [b, m, n, th, tw, co]
    full = jnp.transpose(r, (0, 1, 3, 2, 4, 5)).reshape(
        B, 2 * (H + 1), 2 * (W + 1), Cout)                     # oh' = 2m+th, ow' = 2n+tw
    return full[:, 1:2 * H + 1, 1:2 * W + 1, :]                # crop oh=-1 / oh=2H rows


# Pure-jnp reference (zero-dilation + correlation with flipped kernel) used
# only for a small numerical self-check of the parity decomposition.
def _conv_transpose_ref(x_nhwc, wt, bias, pad):
    B, H, W, Cin = x_nhwc.shape
    Cout = wt.shape[1]
    k, s = 4, 2
    Hd, Wd = (H - 1) * s + 1, (W - 1) * s + 1
    xd = jnp.zeros((B, Hd, Wd, Cin), jnp.float32).at[:, ::s, ::s, :].set(x_nhwc)
    pe = k - 1 - pad
    xp = jnp.pad(xd, ((0, 0), (pe, pe), (pe, pe), (0, 0)))
    Hout = (H - 1) * s - 2 * pad + k
    Wout = (W - 1) * s - 2 * pad + k
    wf = wt[:, :, ::-1, ::-1]
    out = jnp.zeros((B, Hout, Wout, Cout), jnp.float32)
    for kh in range(k):
        for kw in range(k):
            out = out + jnp.einsum(
                "bhwc,cd->bhwd",
                xp[:, kh:kh + Hout, kw:kw + Wout, :], wf[:, :, kh, kw])
    return out + bias


# ----------------------------------------------------------------------------
# Generator forward
# ----------------------------------------------------------------------------
def generator_forward(params, z, c):
    B = z.shape[0]
    # conditionExpand: Linear(24, c_dim) + ReLU  (tiny -> plain XLA per review)
    c_exp = jnp.maximum(c @ params["lin_w"].T + params["lin_b"], 0.0)
    x = jnp.concatenate([z, c_exp], axis=1)                    # (B, z_dim + c_dim)

    # convT1: 1x1 spatial input, pad=0  ->  plain matmul to a (B, 4, 4, 512) map
    p = params["convT1"]
    Cout = p["w"].shape[1]
    w1 = jnp.transpose(p["w"].astype(jnp.bfloat16), (0, 2, 3, 1)).reshape(
        x.shape[1], 16 * Cout)                                 # cols (oh, ow, co)
    y = pallas_matmul(x, w1, jnp.tile(p["b"], 16))             # (B, 16*Cout)
    y = pallas_bn_relu(y.reshape(B * 16, Cout), p["gamma"], p["beta"])
    x = y.reshape(B, 4, 4, Cout)

    # convT2..convT4: parity-decomposed deconv + fused BN/ReLU
    for i in range(2, 5):
        p = params[f"convT{i}"]
        x = conv_transpose2d_s2p1(x, p["w"], p["b"])
        Bc, Ho, Wo, Co = x.shape
        x = pallas_bn_relu(x.reshape(Bc * Ho * Wo, Co),
                           p["gamma"], p["beta"]).reshape(Bc, Ho, Wo, Co)

    # convT5 + tanh (tanh fused into the matmul epilogue)
    p = params["convT5"]
    out = conv_transpose2d_s2p1(x, p["w"], p["b"], activation="tanh")  # (B,64,64,3)
    return jnp.transpose(out, (0, 3, 1, 2))                    # (B, 3, 64, 64) NCHW


def init_params(key, z_dim, c_dim):
    channels = [z_dim + c_dim, 512, 256, 128, 64]
    keys = jax.random.split(key, 8)
    params = {
        "lin_w": 0.02 * jax.random.normal(keys[0], (c_dim, 24), jnp.float32),
        "lin_b": jnp.zeros((c_dim,), jnp.float32),
    }
    for i in range(1, 5):
        cin, cout = channels[i - 1], channels[i]
        params[f"convT{i}"] = {
            "w": 0.02 * jax.random.normal(keys[i], (cin, cout, 4, 4), jnp.float32),
            "b": jnp.zeros((cout,), jnp.float32),
            "gamma": jnp.ones((cout,), jnp.float32),   # BatchNorm2d default affine
            "beta": jnp.zeros((cout,), jnp.float32),
        }
    params["convT5"] = {
        "w": 0.02 * jax.random.normal(keys[5], (64, 3, 4, 4), jnp.float32),
        "b": jnp.zeros((3,), jnp.float32),
    }
    return params


if __name__ == "__main__":
    B, z_dim, c_dim = 2, 100, 24
    key = jax.random.PRNGKey(0)
    kp, kz, kc = jax.random.split(key, 3)

    params = init_params(kp, z_dim, c_dim)
    z = jax.random.normal(kz, (B, z_dim), jnp.float32)
    c = jax.random.normal(kc, (B, 24), jnp.float32)

    # Small numerical self-check of the parity-decomposed deconv vs. reference.
    k1, k2, k3 = jax.random.split(jax.random.PRNGKey(1), 3)
    xt = jax.random.normal(k1, (2, 8, 8, 16), jnp.float32)
    wt = 0.05 * jax.random.normal(k2, (16, 8, 4, 4), jnp.float32)
    bt = 0.05 * jax.random.normal(k3, (8,), jnp.float32)
    got = jax.block_until_ready(jax.jit(conv_transpose2d_s2p1)(xt, wt, bt))
    want = _conv_transpose_ref(xt, wt, bt, pad=1)
    err = float(jnp.max(jnp.abs(got - want)))
    assert err < 5e-2, f"parity-decomposed deconv mismatch: max abs err {err}"

    fwd = jax.jit(functools.partial(generator_forward, params))
    out = jax.block_until_ready(fwd(z, c))

    assert out.shape == (B, 3, 64, 64), out.shape
    assert bool(jnp.all(jnp.isfinite(out)))
    assert bool(jnp.all(jnp.abs(out) <= 1.0 + 1e-6))   # tanh range
    print("KERNEL_OK")
</pallas_src>

<mosaic_0001>
module attributes {stable_mosaic.version = 11 : i64} {
  func.func @kernel(%arg0: i32, %arg1: i32, %arg2: memref<176x128xbf16, #tpu.memory_space<vmem>>, %arg3: memref<128x128xbf16, #tpu.memory_space<vmem>>, %arg4: memref<1x128xf32, #tpu.memory_space<vmem>>, %arg5: memref<176x128xf32, #tpu.memory_space<vmem>>) attributes {dimension_semantics = [#tpu.dimension_semantics<parallel>, #tpu.dimension_semantics<parallel>], iteration_bounds = array<i64: 1, 1>, scalar_prefetch = 0 : i64, scratch_operands = 0 : i64, tpu.core_type = #tpu.core_type<tc>, window_params = [{transform_indices = @transform_0, window_bounds = array<i64: 176, 128>}, {transform_indices = @transform_1, window_bounds = array<i64: 128, 128>}, {transform_indices = @transform_2, window_bounds = array<i64: 1, 128>}, {transform_indices = @transform_3, window_bounds = array<i64: 176, 128>}]} {
    %c0 = arith.constant 0 : index
    %c0_0 = arith.constant 0 : index
    %0 = vector.load %arg2[%c0, %c0_0] : memref<176x128xbf16, #tpu.memory_space<vmem>>, vector<176x128xbf16>
    %c0_1 = arith.constant 0 : index
    %c0_2 = arith.constant 0 : index
    %1 = vector.load %arg3[%c0_1, %c0_2] : memref<128x128xbf16, #tpu.memory_space<vmem>>, vector<128x128xbf16>
    %cst = arith.constant dense<0.000000e+00> : vector<176x128xf32>
    %2 = tpu.matmul %0, %1, %cst {dimension_numbers = #tpu.dot_dimension_numbers<[1], [0], [0], [1], [0, 0, 1, 1], [], []>} : vector<176x128xbf16>, vector<128x128xbf16>, vector<176x128xf32> -> vector<176x128xf32>
    %c0_3 = arith.constant 0 : index
    %c0_4 = arith.constant 0 : index
    %3 = vector.load %arg4[%c0_3, %c0_4] : memref<1x128xf32, #tpu.memory_space<vmem>>, vector<1x128xf32>
    %4 = vector.broadcast %3 : vector<1x128xf32> to vector<176x128xf32>
    %5 = arith.addf %2, %4 : vector<176x128xf32>
    %c0_5 = arith.constant 0 : index
    %c0_6 = arith.constant 0 : index
    %6 = vector.load %arg5[%c0_5, %c0_6] : memref<176x128xf32, #tpu.memory_space<vmem>>, vector<176x128xf32>
    tpu.vector_store %arg5[%c0_5, %c0_6], %5 {strides = array<i32>} : memref<176x128xf32, #tpu.memory_space<vmem>>, vector<176x128xf32>,
    return
  }
  func.func @transform_0(%arg0: i32, %arg1: i32) -> (i32, i32) {
    %c0_i32 = arith.constant 0 : i32
    %c0_i32_0 = arith.constant 0 : i32
    return %arg0, %c0_i32 : i32, i32
  }
  func.func @transform_1(%arg0: i32, %arg1: i32) -> (i32, i32) {
    %c0_i32 = arith.constant 0 : i32
    %c0_i32_0 = arith.constant 0 : i32
    return %c0_i32, %arg1 : i32, i32
  }
  func.func @transform_2(%arg0: i32, %arg1: i32) -> (i32, i32) {
    %c0_i32 = arith.constant 0 : i32
    %c0_i32_0 = arith.constant 0 : i32
    return %c0_i32, %arg1 : i32, i32
  }
  func.func @transform_3(%arg0: i32, %arg1: i32) -> (i32, i32) {
    %c0_i32 = arith.constant 0 : i32
    return %arg0, %arg1 : i32, i32
  }
}

</mosaic_0001>

<bundles_post_ra>
// kernel: tile.8
= control target key start
LH: loop header
LB: loop body
LE: loop exit
PB: predicated region body
PF: predicated region fallthrough
CT: control target
= control target key end

     0   :  { %s22_s0 = inlined_call_operand.vmem [shape: f32[8], index: 0, kind: input, shape index: {}]   ;;  %s23_s1 = inlined_call_operand.vmem [shape: f32[4,8], index: 1, kind: output, shape index: {}]  }
   0x1   :  { %v4_v0 = vld [vmem:[%s22_s0] ss:$0 sm:$0xff] }
   0x2   :  { %5 = vst [vmem:[%s23_s1] sm:$0xf] %v4_v0 }

// kernel: tile.9
= control target key start
LH: loop header
LB: loop body
LE: loop exit
PB: predicated region body
PF: predicated region fallthrough
CT: control target
= control target key end

     0   :  { %vm7_vm0 = vcmask 64512   ;;  %s37_s8 = smov 8   ;;  %s38_s9 = smov 16   ;;  %vm13_vm1 = vcmask 261312   ;;  %vm19_vm2 = vcmask 195712   ;;  %vm25_vm3 = vcmask 130112   ;;  %s55_s0 = inlined_call_operand.vmem [shape: f32[4,8], index: 0, kind: input, shape index: {}]   ;;  %s56_s1 = inlined_call_operand.vmem [shape: f32[32], index: 1, kind: output, shape index: {}]  }
   0x1   :  { %v4_v0 = vld [vmem:[%s55_s0] sm:$0xf]  ;;  %s36_s0 = smov 24  }
   0x2   :  { %5 = vst [vmem:[#allocation1] sm:$0xf] %v4_v0 }
   0x9   :  { %v10_v1 = vld [vmem:[#allocation1 + $0x3] sm:$0x1]   ;;  %v22_v2 = vld [vmem:[#allocation1 + $0x1] sm:$0x1]   ;;  %v6_v3 = vld [vmem:[#allocation1] sm:$0x1]  }
   0xa   :  { %11 = vrot.lane.b32.xlu0 %v10_v1, %s36_s0  ;;  %23 = vrot.lane.b32.xlu1 %v22_v2, %s37_s8  ;;  %v16_v4 = vld [vmem:[#allocation1 + $0x2] sm:$0x1]   ;;  %8 = vst.msk [vmem:[#allocation0] sm:$0x1] %vm7_vm0, %v6_v3  }
   0xe   :  { %17 = vrot.lane.b32.xlu0 %v16_v4, %s38_s9 }
  0x7c   :  { %v12_v5 = vpop.permute.xlu0 %11   ;;  %v24_v6 = vpop.permute.xlu1 %23  }
  0x7d   :  { %14 = vst.msk [vmem:[#allocation0] sm:$0x1] %vm13_vm1, %v12_v5  }
  0x80   :  { %v18_v7 = vpop.permute.xlu0 %17  }
  0x81   :  { %20 = vst.msk [vmem:[#allocation0] sm:$0x1] %vm19_vm2, %v18_v7  }
  0x82   :  { %26 = vst.msk [vmem:[#allocation0] sm:$0x1] %vm25_vm3, %v24_v6  }
  0x89   :  { %v30_v8 = vld [vmem:[#allocation0] sm:$0x1] }
  0x8a   :  { %32 = vst [vmem:[%s56_s1] sm:$0x1] %v30_v8 }

// kernel: conv_transpose2d_s2p1.1
= control target key start
LH: loop header
LB: loop body
LE: loop exit
PB: predicated region body
PF: predicated region fallthrough
CT: control target
= control target key end

     0   :  { %v457_v0 = vmov 0.0   ;;  %vm458_vm0 = vmmov 0   ;;  %s667_s1 = inlined_call_operand.vmem [shape: bf16[128,128], index: 1, kind: input, shape index: {}]   ;;  %s668_s0 = inlined_call_operand.vmem [shape: bf16[176,128], index: 0, kind: input, shape index: {}]   ;;  %s669_s2 = inlined_call_operand.vmem [shape: f32[1,128], index: 2, kind: input, shape index: {}]   ;;  %s670_s3 = inlined_call_operand.vmem [shape: f32[176,128], index: 3, kind: output, shape index: {}]  }
   0x1   :  { %360 = vmatprep.subr.bf16.mxu0 %v457_v0  ;;  %v438_v1 = vld [vmem:[%s667_s1] sm:$0xff]   ;;  %420 = vmatprep.subr.bf16.mxu1 %v457_v0  ;;  %v439_v2 = vld [vmem:[%s667_s1 + $0x8] sm:$0xff]   ;;  %v440_v3 = vld [vmem:[%s667_s1 + $0x10] sm:$0xff]  }
   0x2   :  { %376 = vmatprep.mubr.msk.bf16.mxu0 %vm458_vm0, %v457_v0  ;;  %400 = vmatprep.mubr.msk.bf16.mxu1 %vm458_vm0, %v457_v0  ;;  %v441_v4 = vld [vmem:[%s667_s1 + $0x18] sm:$0xff]   ;;  %v442_v5 = vld [vmem:[%s667_s1 + $0x20] sm:$0xff]   ;;  %v443_v6 = vld [vmem:[%s667_s1 + $0x28] sm:$0xff]  }
   0x3   :  { %361 = vmatpush3.bf16.msra.mxu0 %v438_v1  ;;  %428 = vmatpush3.bf16.msra.mxu1 %v438_v1  ;;  %v444_v7 = vld [vmem:[%s667_s1 + $0x30] sm:$0xff]   ;;  %v445_v8 = vld [vmem:[%s667_s1 + $0x38] sm:$0xff]   ;;  %v446_v9 = vld [vmem:[%s668_s0] sm:$0xff]  }
   0x4   :  { %362 = vmatprep.subr.bf16.mxu0 %v457_v0  ;;  %421 = vmatprep.subr.bf16.mxu1 %v457_v0  ;;  %v447_v10 = vld [vmem:[%s668_s0 + $0x30] sm:$0xff]   ;;  %v448_v11 = vld [vmem:[%s668_s0 + $0x8] sm:$0xff]   ;;  %v449_v12 = vld [vmem:[%s668_s0 + $0x38] sm:$0xff]  }
   0x5   :  { %v450_v13 = vld [vmem:[%s668_s0 + $0x10] sm:$0xff]   ;;  %v451_v14 = vld [vmem:[%s668_s0 + $0x40] sm:$0xff]   ;;  %v452_v15 = vld [vmem:[%s668_s0 + $0x18] sm:$0xff]  }
   0x6   :  { %v453_v16 = vld [vmem:[%s668_s0 + $0x48] sm:$0xff]   ;;  %v454_v17 = vld [vmem:[%s668_s0 + $0x20] sm:$0xff]   ;;  %v455_v18 = vld [vmem:[%s668_s0 + $0x50] sm:$0xff]  }
   0x7   :  { %363 = vmatpush3.bf16.msra.mxu0 %v439_v2  ;;  %429 = vmatpush3.bf16.msra.mxu1 %v439_v2  ;;  %v456_v19 = vld [vmem:[%s668_s0 + $0x28] sm:$0xff]   ;;  %v577_v20 = vld [vmem:[%s669_s2] ss:$0 sm:$0xff] }
   0x8   :  { %364 = vmatprep.subr.bf16.mxu0 %v457_v0  ;;  %422 = vmatprep.subr.bf16.mxu1 %v457_v0 }
   0xb   :  { %365 = vmatpush3.bf16.msra.mxu0 %v440_v3  ;;  %430 = vmatpush3.bf16.msra.mxu1 %v440_v3 }
   0xc   :  { %366 = vmatprep.subr.bf16.mxu0 %v457_v0  ;;  %423 = vmatprep.subr.bf16.mxu1 %v457_v0 }
   0xf   :  { %367 = vmatpush3.bf16.msra.mxu0 %v441_v4  ;;  %431 = vmatpush3.bf16.msra.mxu1 %v441_v4 }
  0x10   :  { %368 = vmatprep.subr.bf16.mxu0 %v457_v0  ;;  %424 = vmatprep.subr.bf16.mxu1 %v457_v0 }
  0x13   :  { %369 = vmatpush3.bf16.msra.mxu0 %v442_v5  ;;  %432 = vmatpush3.bf16.msra.mxu1 %v442_v5 }
  0x14   :  { %370 = vmatprep.subr.bf16.mxu0 %v457_v0  ;;  %425 = vmatprep.subr.bf16.mxu1 %v457_v0 }
  0x17   :  { %371 = vmatpush3.bf16.msra.mxu0 %v443_v6  ;;  %433 = vmatpush3.bf16.msra.mxu1 %v443_v6 }
  0x18   :  { %372 = vmatprep.subr.bf16.mxu0 %v457_v0  ;;  %426 = vmatprep.subr.bf16.mxu1 %v457_v0 }
  0x1b   :  { %373 = vmatpush3.bf16.msra.mxu0 %v444_v7  ;;  %434 = vmatpush3.bf16.msra.mxu1 %v444_v7 }
  0x1c   :  { %374 = vmatprep.subr.bf16.mxu0 %v457_v0  ;;  %427 = vmatprep.subr.bf16.mxu1 %v457_v0 }
  0x1f   :  { %375 = vmatpush3.bf16.msra.mxu0 %v445_v8  ;;  %435 = vmatpush3.bf16.msra.mxu1 %v445_v8 }
  0x22   :  { %377 = vmatmul.mubr.bf16.vlgmr.msra.gmra.mrb[0].mxu0 %v446_v9  ;;  %401 = vmatmul.mubr.bf16.vlgmr.msra.gmra.mrb[0].mxu1 %v447_v10 }
  0x23   :  { %380 = vmatprep.mubr.msk.bf16.mxu0 %vm458_vm0, %v457_v0  ;;  %404 = vmatprep.mubr.msk.bf16.mxu1 %vm458_vm0, %v457_v0 }
  0x2a   :  { %381 = vmatmul.mubr.bf16.gmra.mrb[4].mxu0 %v448_v11  ;;  %405 = vmatmul.mubr.bf16.gmra.mrb[4].mxu1 %v449_v12 }
  0x2b   :  { %384 = vmatprep.mubr.msk.bf16.mxu0 %vm458_vm0, %v457_v0  ;;  %408 = vmatprep.mubr.msk.bf16.mxu1 %vm458_vm0, %v457_v0 }
  0x32   :  { %385 = vmatmul.mubr.bf16.gmra.mrb[8].mxu0 %v450_v13  ;;  %409 = vmatmul.mubr.bf16.gmra.mrb[8].mxu1 %v451_v14 }
  0x33   :  { %388 = vmatprep.mubr.msk.bf16.mxu0 %vm458_vm0, %v457_v0  ;;  %412 = vmatprep.mubr.msk.bf16.mxu1 %vm458_vm0, %v457_v0 }
  0x3a   :  { %389 = vmatmul.mubr.bf16.gmra.mrb[12].mxu0 %v452_v15  ;;  %413 = vmatmul.mubr.bf16.gmra.mrb[12].mxu1 %v453_v16 }
  0x3b   :  { %392 = vmatprep.mubr.msk.bf16.mxu0 %vm458_vm0, %v457_v0  ;;  %416 = vmatprep.mubr.msk.bf16.mxu1 %vm458_vm0, %v457_v0 }
  0x42   :  { %393 = vmatmul.mubr.bf16.gmra.mrb[16].mxu0 %v454_v17  ;;  %417 = vmatmul.mubr.bf16.gmra.mrb[16].mxu1 %v455_v18 }
  0x43   :  { %396 = vmatprep.mubr.msk.bf16.mxu0 %vm458_vm0, %v457_v0 }
  0x4a   :  { %397 = vmatmul.mubr.bf16.gmra.mrb[20].mxu0 %v456_v19 }
  0xf5   :  { %v208_v21 = vpop.f32.mrb[0].mxu0  ;;  %v256_v22 = vpop.f32.mrb[0].mxu1 }
  0xf6   :  { %v209_v23 = vadd.f32 %v577_v20, %v208_v21  ;;  %v378_v24 = vpop.f32.mrb[1].mxu0  ;;  %v257_v25 = vadd.f32 %v577_v20, %v256_v22  ;;  %v402_v26 = vpop.f32.mrb[1].mxu1 }
  0xf7   :  { %v211_v27 = vpop.f32.mrb[2].mxu0  ;;  %v259_v28 = vpop.f32.mrb[2].mxu1 }
  0xf8   :  { %295 = vst [vmem:[%s670_s3] sm:$0xff] %v209_v23  ;;  %v212_v29 = vadd.f32 %v577_v20, %v211_v27  ;;  %v379_v30 = vpop.f32.mrb[3].mxu0  ;;  %307 = vst [vmem:[%s670_s3 + $0x60] sm:$0xff] %v257_v25  ;;  %v260_v31 = vadd.f32 %v577_v20, %v259_v28  ;;  %v403_v32 = vpop.f32.mrb[3].mxu1 }
  0xfa   :  { %296 = vst [vmem:[%s670_s3 + $0x8] sm:$0xff] %v212_v29  ;;  %308 = vst [vmem:[%s670_s3 + $0x68] sm:$0xff] %v260_v31 }
  0xfd   :  { %v216_v33 = vpop.f32.mrb[4].mxu0  ;;  %v264_v34 = vpop.f32.mrb[4].mxu1 }
  0xfe   :  { %v217_v35 = vadd.f32 %v577_v20, %v216_v33  ;;  %v382_v36 = vpop.f32.mrb[5].mxu0  ;;  %v265_v37 = vadd.f32 %v577_v20, %v264_v34  ;;  %v406_v38 = vpop.f32.mrb[5].mxu1 }
  0xff   :  { %v219_v39 = vpop.f32.mrb[6].mxu0  ;;  %v267_v40 = vpop.f32.mrb[6].mxu1 }
 0x100   :  { %297 = vst [vmem:[%s670_s3 + $0x10] sm:$0xff] %v217_v35  ;;  %v220_v41 = vadd.f32 %v577_v20, %v219_v39  ;;  %v383_v42 = vpop.f32.mrb[7].mxu0  ;;  %309 = vst [vmem:[%s670_s3 + $0x70] sm:$0xff] %v265_v37  ;;  %v268_v43 = vadd.f32 %v577_v20, %v267_v40  ;;  %v407_v44 = vpop.f32.mrb[7].mxu1 }
 0x102   :  { %298 = vst [vmem:[%s670_s3 + $0x18] sm:$0xff] %v220_v41  ;;  %310 = vst [vmem:[%s670_s3 + $0x78] sm:$0xff] %v268_v43 }
 0x105   :  { %v224_v45 = vpop.f32.mrb[8].mxu0  ;;  %v272_v46 = vpop.f32.mrb[8].mxu1 }
 0x106   :  { %v225_v47 = vadd.f32 %v577_v20, %v224_v45  ;;  %v386_v48 = vpop.f32.mrb[9].mxu0  ;;  %v273_v49 = vadd.f32 %v577_v20, %v272_v46  ;;  %v410_v50 = vpop.f32.mrb[9].mxu1 }
 0x107   :  { %v227_v51 = vpop.f32.mrb[10].mxu0  ;;  %v275_v52 = vpop.f32.mrb[10].mxu1 }
 0x108   :  { %299 = vst [vmem:[%s670_s3 + $0x20] sm:$0xff] %v225_v47  ;;  %v228_v53 = vadd.f32 %v577_v20, %v227_v51  ;;  %v387_v54 = vpop.f32.mrb[11].mxu0  ;;  %311 = vst [vmem:[%s670_s3 + $0x80] sm:$0xff] %v273_v49  ;;  %v276_v55 = vadd.f32 %v577_v20, %v275_v52  ;;  %v411_v56 = vpop.f32.mrb[11].mxu1 }
 0x10a   :  { %300 = vst [vmem:[%s670_s3 + $0x28] sm:$0xff] %v228_v53  ;;  %312 = vst [vmem:[%s670_s3 + $0x88] sm:$0xff] %v276_v55 }
 0x10d   :  { %v232_v57 = vpop.f32.mrb[12].mxu0  ;;  %v280_v58 = vpop.f32.mrb[12].mxu1 }
 0x10e   :  { %v233_v59 = vadd.f32 %v577_v20, %v232_v57  ;;  %v390_v60 = vpop.f32.mrb[13].mxu0  ;;  %v281_v61 = vadd.f32 %v577_v20, %v280_v58  ;;  %v414_v62 = vpop.f32.mrb[13].mxu1 }
 0x10f   :  { %v235_v63 = vpop.f32.mrb[14].mxu0  ;;  %v283_v0 = vpop.f32.mrb[14].mxu1 }
 0x110   :  { %301 = vst [vmem:[%s670_s3 + $0x30] sm:$0xff] %v233_v59  ;;  %v236_v1 = vadd.f32 %v577_v20, %v235_v63  ;;  %v391_v2 = vpop.f32.mrb[15].mxu0  ;;  %313 = vst [vmem:[%s670_s3 + $0x90] sm:$0xff] %v281_v61  ;;  %v284_v3 = vadd.f32 %v577_v20, %v283_v0  ;;  %v415_v4 = vpop.f32.mrb[15].mxu1 }
 0x112   :  { %302 = vst [vmem:[%s670_s3 + $0x38] sm:$0xff] %v236_v1  ;;  %314 = vst [vmem:[%s670_s3 + $0x98] sm:$0xff] %v284_v3 }
 0x115   :  { %v240_v5 = vpop.f32.mrb[16].mxu0  ;;  %v288_v6 = vpop.f32.mrb[16].mxu1 }
 0x116   :  { %v241_v7 = vadd.f32 %v577_v20, %v240_v5  ;;  %v394_v8 = vpop.f32.mrb[17].mxu0  ;;  %v289_v9 = vadd.f32 %v577_v20, %v288_v6  ;;  %v418_v10 = vpop.f32.mrb[17].mxu1 }
 0x117   :  { %v243_v11 = vpop.f32.mrb[18].mxu0  ;;  %v291_v12 = vpop.f32.mrb[18].mxu1 }
 0x118   :  { %303 = vst [vmem:[%s670_s3 + $0x40] sm:$0xff] %v241_v7  ;;  %v244_v13 = vadd.f32 %v577_v20, %v243_v11  ;;  %v395_v14 = vpop.f32.mrb[19].mxu0  ;;  %315 = vst [vmem:[%s670_s3 + $0xa0] sm:$0xff] %v289_v9  ;;  %v292_v15 = vadd.f32 %v577_v20, %v291_v12  ;;  %v419_v16 = vpop.f32.mrb[19].mxu1 }
 0x11a   :  { %304 = vst [vmem:[%s670_s3 + $0x48] sm:$0xff] %v244_v13  ;;  %316 = vst [vmem:[%s670_s3 + $0xa8] sm:$0xff] %v292_v15 }
 0x11d   :  { %v248_v17 = vpop.f32.mrb[20].mxu0 }
 0x11e   :  { %v249_v18 = vadd.f32 %v577_v20, %v248_v17  ;;  %v398_v19 = vpop.f32.mrb[21].mxu0 }
 0x11f   :  { %v251_v21 = vpop.f32.mrb[22].mxu0 }
 0x120   :  { %305 = vst [vmem:[%s670_s3 + $0x50] sm:$0xff] %v249_v18  ;;  %v252_v22 = vadd.f32 %v577_v20, %v251_v21  ;;  %v399_v23 = vpop.f32.mrb[23].mxu0 }
 0x122   :  { %306 = vst [vmem:[%s670_s3 + $0x58] sm:$0xff] %v252_v22 }

</bundles_post_ra>
